<compile_context>
chip_gen: v5e
topology: v5e:2x2
jax: 0.10.0
libtpu: 0.0.40
codegen_flags: <defaults>
</compile_context>

<pallas_src>
import jax
import jax.numpy as jnp
from jax import lax
from jax.experimental import pallas as pl
from jax.experimental.pallas import tpu as pltpu

_EPS = 1e-5


def _make_bottleneck_kernel(N, H, W, C):
    """Fused 3-block kernel, closed over the static shape."""
    NH, WC = N * H, W * C
    inv_count = 1.0 / float(N * H * W)
    n_butterfly = W.bit_length() - 1        # log2(W); W*C == 128 => W is 2^k

    def kernel(x_ref, band_ref, g_ref, b_ref, o_ref):
        # x_ref    : (NH, WC)       activations, lane-dense (lane = x*C + c), f32
        # band_ref : (3, 3*WC, WC)  banded conv weights, ky taps stacked on K, bf16
        # g_ref    : (3, 1, WC)     BN gamma (tiled over x on lanes), f32
        # b_ref    : (3, 1, WC)     BN beta, f32
        # o_ref    : (NH, WC)       output of the last block, f32
        row_y = lax.broadcasted_iota(jnp.int32, (NH, WC), 0) % H
        up_ok = row_y != 0            # zero the y-1 tap on the top image row
        dn_ok = row_y != (H - 1)      # zero the y+1 tap on the bottom image row

        x = x_ref[...]
        for blk in range(3):  # unrolled; intermediates never leave VMEM/vregs
            # ky taps via XLU sublane rolls + boundary select (no (NH,NH) matmul).
            x_up = jnp.where(up_ok, pltpu.roll(x, shift=1, axis=0), 0.0)
            x_dn = jnp.where(dn_ok, pltpu.roll(x, shift=NH - 1, axis=0), 0.0)
            # Single K=3*WC MXU matmul, bf16 operands, f32 accumulation.
            xk = jnp.concatenate([x_up, x, x_dn], axis=1).astype(jnp.bfloat16)
            acc = jnp.dot(xk, band_ref[blk], preferred_element_type=jnp.float32)
            # Conv bias omitted on purpose: training-mode BN mean subtraction
            # cancels a per-channel bias exactly.

            # BatchNorm2d (training mode), single pass: sum & sum-of-squares.
            stats = jnp.concatenate(
                [jnp.sum(acc, axis=0, keepdims=True),
                 jnp.sum(acc * acc, axis=0, keepdims=True)], axis=0)   # (2, WC)
            # Lane rotate-add butterfly: reduces over the W lane-groups and
            # broadcasts the per-channel totals back to every lane-group.
            for k in range(n_butterfly):
                stats = stats + pltpu.roll(stats, shift=C * (1 << k), axis=1)
            mean = stats[0:1] * inv_count
            var = jnp.maximum(stats[1:2] * inv_count - mean * mean, 0.0)
            scale = lax.rsqrt(var + _EPS) * g_ref[blk]                 # (1, WC)
            y = jnp.maximum((acc - mean) * scale + b_ref[blk], 0.0)

            if blk < 2:
                x = x + y          # residual add -> next block's input (in VMEM)
            else:
                o_ref[...] = y     # module returns res2_out (no add on output)

    return kernel


def _banded_conv_weights(w, W_sp):
    """(kh, kw, Cin, Cout) HWIO -> (kh*W*Cin, W*Cout) banded matrix.

    band[ky*W*Cin + xi*Cin + ci, xo*Cout + co] = w[ky, xi-xo+pad, ci, co] when
    that kx tap is in range, else 0: kx taps, channel mixing and the 'same'
    zero padding along x are folded into one lane-dense matmul; the 3 ky taps
    are stacked on the contraction axis (K = 3*W*Cin)."""
    kh, kw, Cin, Cout = w.shape
    pad = (kw - 1) // 2
    xi = jnp.arange(W_sp)[:, None]
    xo = jnp.arange(W_sp)[None, :]
    kx = xi - xo + pad
    valid = (kx >= 0) & (kx < kw)
    kx_c = jnp.clip(kx, 0, kw - 1)
    band = w[:, kx_c]                                   # (kh, W, W, Cin, Cout)
    band = band * valid[None, :, :, None, None].astype(w.dtype)
    band = jnp.transpose(band, (0, 1, 3, 2, 4))         # (kh, W[xi], Cin, W[xo], Cout)
    return band.reshape(kh * W_sp * Cin, W_sp * Cout)


def prepare_params(params, W_sp):
    """Precompute kernel-side weight tensors ONCE per weight set (hoisted out
    of the per-call jitted forward)."""
    bands = jnp.stack([_banded_conv_weights(w.astype(jnp.float32), W_sp)
                       for (w, _b, _g, _bt) in params]).astype(jnp.bfloat16)
    gammas = jnp.stack([jnp.tile(g.astype(jnp.float32), W_sp)[None, :]
                        for (_w, _b, g, _bt) in params])      # (3, 1, WC)
    betas = jnp.stack([jnp.tile(bt.astype(jnp.float32), W_sp)[None, :]
                       for (_w, _b, _g, bt) in params])       # (3, 1, WC)
    return bands, gammas, betas


@jax.jit
def bottleneck_forward(x_nchw, bands, gammas, betas):
    """Pallas implementation of Bottleneck.forward. x_nchw: (N, C, H, W)."""
    N, C, H, W = x_nchw.shape
    assert W * C == 128, "kernel assumes lane-dense W*C == 128"
    assert (N * H) % 8 == 0, "N*H must be a multiple of the f32 sublane tile (8)"
    # Lane-dense layout: NCHW -> NHWC -> (N*H, W*C); lane index = x*C + c.
    x2d = jnp.transpose(x_nchw, (0, 2, 3, 1)).astype(jnp.float32).reshape(N * H, W * C)

    kernel = _make_bottleneck_kernel(N, H, W, C)
    vmem = pl.BlockSpec(memory_space=pltpu.MemorySpace.VMEM)
    out2d = pl.pallas_call(
        kernel,
        out_shape=jax.ShapeDtypeStruct((N * H, W * C), jnp.float32),
        in_specs=[vmem] * 4,
        out_specs=vmem,
        compiler_params=pltpu.CompilerParams(vmem_limit_bytes=32 * 1024 * 1024),
    )(x2d, bands, gammas, betas)
    # TODO(synk): for production-size inputs, add a row-tiled grid over N*H
    # (dimension_semantics=("parallel",), ~512-1024 row tiles, budgeted for
    # v7x's 64 MiB VMEM) with a two-phase BN (sum/sumsq accumulated on an
    # "arbitrary" axis, normalize in a second pass), and gate the K=384 fusion
    # per-generation (v5e's 128-deep MXU gains nothing from it).
    return jnp.transpose(out2d.reshape(N, H, W, C), (0, 3, 1, 2))


def _reference_block(x_nhwc, w, b, gamma, beta):
    """Pure-JAX reference for one conv+bn+relu block, at the kernel's MXU
    precision (bf16-rounded operands, f32 accumulation)."""
    xq = x_nhwc.astype(jnp.bfloat16).astype(jnp.float32)
    wq = w.astype(jnp.bfloat16).astype(jnp.float32)
    y = lax.conv_general_dilated(
        xq, wq, window_strides=(1, 1), padding="SAME",
        dimension_numbers=("NHWC", "HWIO", "NHWC"),
        precision=lax.Precision.HIGHEST)
    y = y + b[None, None, None, :]     # bias is a no-op under training-mode BN
    mean = jnp.mean(y, axis=(0, 1, 2))
    var = jnp.mean((y - mean) ** 2, axis=(0, 1, 2))
    y = (y - mean) * lax.rsqrt(var + _EPS) * gamma + beta
    return jnp.maximum(y, 0.0)


def _reference_forward(x_nchw, params):
    x = jnp.transpose(x_nchw, (0, 2, 3, 1)).astype(jnp.float32)
    r0 = _reference_block(x, *params[0])
    r1_in = x + r0
    r1 = _reference_block(r1_in, *params[1])
    r2_in = r1_in + r1
    r2 = _reference_block(r2_in, *params[2])
    return jnp.transpose(r2, (0, 3, 1, 2))


def init_params(key, in_channels, out_channels, kernel_size=3):
    """Deterministic parameter init for the three conv+bn blocks (HWIO weights)."""
    params = []
    cin = in_channels
    for _ in range(3):
        key, kw_, kb_, kg_, kbt_ = jax.random.split(key, 5)
        fan_in = cin * kernel_size * kernel_size
        scale = 1.0 / jnp.sqrt(fan_in)
        w = jax.random.uniform(kw_, (kernel_size, kernel_size, cin, out_channels),
                               jnp.float32, -scale, scale)
        b = jax.random.uniform(kb_, (out_channels,), jnp.float32, -scale, scale)
        gamma = 1.0 + 0.1 * jax.random.normal(kg_, (out_channels,), jnp.float32)
        beta = 0.1 * jax.random.normal(kbt_, (out_channels,), jnp.float32)
        params.append((w, b, gamma, beta))
        cin = out_channels
    return params


if __name__ == "__main__":
    key = jax.random.PRNGKey(0)
    k_x, k_p = jax.random.split(key)

    # Residual adds require in_channels == out_channels; W*C = 16*8 = 128 lanes.
    N, C, H, W = 2, 8, 16, 16
    x = jax.random.normal(k_x, (N, C, H, W), jnp.float32)  # NCHW (PyTorch layout)

    params = init_params(k_p, in_channels=C, out_channels=C, kernel_size=3)
    bands, gammas, betas = prepare_params(params, W)       # hoisted: once per weights

    out = jax.block_until_ready(bottleneck_forward(x, bands, gammas, betas))
    assert out.shape == (N, C, H, W), out.shape

    ref = jax.block_until_ready(_reference_forward(x, params))
    max_err = float(jnp.abs(out - ref).max())
    assert jnp.allclose(out, ref, atol=2e-3, rtol=2e-3), max_err

    print("KERNEL_OK")
</pallas_src>

<mosaic_0001>
module attributes {stable_mosaic.version = 11 : i64} {
  func.func @kernel(%arg0: memref<32x128xf32, #tpu.memory_space<vmem>>, %arg1: memref<3x384x128xbf16, #tpu.memory_space<vmem>>, %arg2: memref<3x1x128xf32, #tpu.memory_space<vmem>>, %arg3: memref<3x1x128xf32, #tpu.memory_space<vmem>>, %arg4: memref<32x128xf32, #tpu.memory_space<vmem>>) attributes {dimension_semantics = [], scalar_prefetch = 0 : i64, scratch_operands = 0 : i64, tpu.core_type = #tpu.core_type<tc>} {
    %0 = tpu.iota {dimensions = array<i32: 0>} : vector<32x128xi32>
    %c16_i32 = arith.constant 16 : i32
    %c0_i32 = arith.constant 0 : i32
    %1 = arith.cmpi eq, %c16_i32, %c0_i32 : i32
    %c1_i32 = arith.constant 1 : i32
    %2 = arith.select %1, %c1_i32, %c16_i32 : i32
    %3 = vector.broadcast %2 : i32 to vector<32x128xi32>
    %4 = arith.remsi %0, %3 : vector<32x128xi32>
    %c0_i32_0 = arith.constant 0 : i32
    %5 = vector.broadcast %c0_i32_0 : i32 to vector<32x128xi32>
    %6 = arith.cmpi ne, %4, %5 : vector<32x128xi32>
    %c0_i32_1 = arith.constant 0 : i32
    %7 = vector.broadcast %c0_i32_1 : i32 to vector<32x128xi32>
    %8 = arith.cmpi slt, %4, %7 : vector<32x128xi32>
    %c0_i32_2 = arith.constant 0 : i32
    %9 = arith.cmpi slt, %2, %c0_i32_2 : i32
    %10 = vector.broadcast %9 : i1 to vector<32x128xi1>
    %11 = vector.broadcast %10 : vector<32x128xi1> to vector<32x128xi1>
    %12 = arith.xori %8, %11 : vector<32x128xi1>
    %13 = arith.andi %12, %6 : vector<32x128xi1>
    %14 = vector.broadcast %2 : i32 to vector<32x128xi32>
    %15 = arith.addi %4, %14 : vector<32x128xi32>
    %16 = arith.select %13, %15, %4 : vector<32x128xi1>, vector<32x128xi32>
    %c0_i32_3 = arith.constant 0 : i32
    %17 = vector.broadcast %c0_i32_3 : i32 to vector<32x128xi32>
    %18 = arith.cmpi ne, %16, %17 : vector<32x128xi32>
    %c15_i32 = arith.constant 15 : i32
    %19 = vector.broadcast %c15_i32 : i32 to vector<32x128xi32>
    %20 = arith.cmpi ne, %16, %19 : vector<32x128xi32>
    %c0 = arith.constant 0 : index
    %c0_4 = arith.constant 0 : index
    %21 = vector.load %arg0[%c0, %c0_4] : memref<32x128xf32, #tpu.memory_space<vmem>>, vector<32x128xf32>
    %c1_i32_5 = arith.constant 1 : i32
    %22 = tpu.dynamic_rotate %21 by %c1_i32_5 dim 0 : vector<32x128xf32>, i32 -> vector<32x128xf32>
    %cst = arith.constant 0.000000e+00 : f32
    %23 = vector.broadcast %cst : f32 to vector<32x128xf32>
    %24 = arith.select %18, %22, %23 : vector<32x128xi1>, vector<32x128xf32>
    %c31_i32 = arith.constant 31 : i32
    %25 = tpu.dynamic_rotate %21 by %c31_i32 dim 0 : vector<32x128xf32>, i32 -> vector<32x128xf32>
    %cst_6 = arith.constant 0.000000e+00 : f32
    %26 = vector.broadcast %cst_6 : f32 to vector<32x128xf32>
    %27 = arith.select %20, %25, %26 : vector<32x128xi1>, vector<32x128xf32>
    %28 = tpu.concatenate %24, %21, %27 in 1 : vector<32x128xf32>, vector<32x128xf32>, vector<32x128xf32> -> vector<32x384xf32>
    %29 = arith.truncf %28 : vector<32x384xf32> to vector<32x384xbf16>
    %c0_7 = arith.constant 0 : index
    %c0_8 = arith.constant 0 : index
    %c0_9 = arith.constant 0 : index
    %30 = vector.load %arg1[%c0_7, %c0_8, %c0_9] : memref<3x384x128xbf16, #tpu.memory_space<vmem>>, vector<1x384x128xbf16>
    %31 = vector.shape_cast %30 : vector<1x384x128xbf16> to vector<384x128xbf16>
    %cst_10 = arith.constant dense<0.000000e+00> : vector<32x128xf32>
    %32 = tpu.matmul %29, %31, %cst_10 {dimension_numbers = #tpu.dot_dimension_numbers<[1], [0], [0], [1], [0, 0, 1, 1], [], []>} : vector<32x384xbf16>, vector<384x128xbf16>, vector<32x128xf32> -> vector<32x128xf32>
    %cst_11 = arith.constant dense<0.000000e+00> : vector<128xf32>
    %33 = vector.multi_reduction <add>, %32, %cst_11 [0] : vector<32x128xf32> to vector<128xf32>
    %34 = vector.shape_cast %33 : vector<128xf32> to vector<1x128xf32>
    %35 = arith.mulf %32, %32 : vector<32x128xf32>
    %cst_12 = arith.constant dense<0.000000e+00> : vector<128xf32>
    %36 = vector.multi_reduction <add>, %35, %cst_12 [0] : vector<32x128xf32> to vector<128xf32>
    %37 = vector.shape_cast %36 : vector<128xf32> to vector<1x128xf32>
    %38 = tpu.concatenate %34, %37 in 0 : vector<1x128xf32>, vector<1x128xf32> -> vector<2x128xf32>
    %c8_i32 = arith.constant 8 : i32
    %39 = tpu.dynamic_rotate %38 by %c8_i32 dim 1 : vector<2x128xf32>, i32 -> vector<2x128xf32>
    %40 = arith.addf %38, %39 : vector<2x128xf32>
    %c16_i32_13 = arith.constant 16 : i32
    %41 = tpu.dynamic_rotate %40 by %c16_i32_13 dim 1 : vector<2x128xf32>, i32 -> vector<2x128xf32>
    %42 = arith.addf %40, %41 : vector<2x128xf32>
    %c32_i32 = arith.constant 32 : i32
    %43 = tpu.dynamic_rotate %42 by %c32_i32 dim 1 : vector<2x128xf32>, i32 -> vector<2x128xf32>
    %44 = arith.addf %42, %43 : vector<2x128xf32>
    %c64_i32 = arith.constant 64 : i32
    %45 = tpu.dynamic_rotate %44 by %c64_i32 dim 1 : vector<2x128xf32>, i32 -> vector<2x128xf32>
    %46 = arith.addf %44, %45 : vector<2x128xf32>
    %47 = vector.extract_strided_slice %46 {offsets = [0, 0], sizes = [1, 128], strides = [1, 1]} : vector<2x128xf32> to vector<1x128xf32>
    %cst_14 = arith.constant 0.001953125 : f32
    %48 = vector.broadcast %cst_14 : f32 to vector<1x128xf32>
    %49 = arith.mulf %47, %48 : vector<1x128xf32>
    %50 = vector.extract_strided_slice %46 {offsets = [1, 0], sizes = [1, 128], strides = [1, 1]} : vector<2x128xf32> to vector<1x128xf32>
    %cst_15 = arith.constant 0.001953125 : f32
    %51 = vector.broadcast %cst_15 : f32 to vector<1x128xf32>
    %52 = arith.mulf %50, %51 : vector<1x128xf32>
    %53 = arith.mulf %49, %49 : vector<1x128xf32>
    %54 = arith.subf %52, %53 : vector<1x128xf32>
    %cst_16 = arith.constant 0.000000e+00 : f32
    %55 = vector.broadcast %cst_16 : f32 to vector<1x128xf32>
    %56 = arith.maximumf %54, %55 : vector<1x128xf32>
    %cst_17 = arith.constant 9.99999974E-6 : f32
    %57 = vector.broadcast %cst_17 : f32 to vector<1x128xf32>
    %58 = arith.addf %56, %57 : vector<1x128xf32>
    %59 = math.rsqrt %58 : vector<1x128xf32>
    %c0_18 = arith.constant 0 : index
    %c0_19 = arith.constant 0 : index
    %c0_20 = arith.constant 0 : index
    %60 = vector.load %arg2[%c0_18, %c0_19, %c0_20] : memref<3x1x128xf32, #tpu.memory_space<vmem>>, vector<1x1x128xf32>
    %61 = vector.shape_cast %60 : vector<1x1x128xf32> to vector<1x128xf32>
    %62 = arith.mulf %59, %61 : vector<1x128xf32>
    %63 = vector.broadcast %49 : vector<1x128xf32> to vector<32x128xf32>
    %64 = arith.subf %32, %63 : vector<32x128xf32>
    %65 = vector.broadcast %62 : vector<1x128xf32> to vector<32x128xf32>
    %66 = arith.mulf %64, %65 : vector<32x128xf32>
    %c0_21 = arith.constant 0 : index
    %c0_22 = arith.constant 0 : index
    %c0_23 = arith.constant 0 : index
    %67 = vector.load %arg3[%c0_21, %c0_22, %c0_23] : memref<3x1x128xf32, #tpu.memory_space<vmem>>, vector<1x1x128xf32>
    %68 = vector.shape_cast %67 : vector<1x1x128xf32> to vector<1x128xf32>
    %69 = vector.broadcast %68 : vector<1x128xf32> to vector<32x128xf32>
    %70 = arith.addf %66, %69 : vector<32x128xf32>
    %cst_24 = arith.constant 0.000000e+00 : f32
    %71 = vector.broadcast %cst_24 : f32 to vector<32x128xf32>
    %72 = arith.maximumf %70, %71 : vector<32x128xf32>
    %73 = arith.addf %21, %72 : vector<32x128xf32>
    %c1_i32_25 = arith.constant 1 : i32
    %74 = tpu.dynamic_rotate %73 by %c1_i32_25 dim 0 : vector<32x128xf32>, i32 -> vector<32x128xf32>
    %cst_26 = arith.constant 0.000000e+00 : f32
    %75 = vector.broadcast %cst_26 : f32 to vector<32x128xf32>
    %76 = arith.select %18, %74, %75 : vector<32x128xi1>, vector<32x128xf32>
    %c31_i32_27 = arith.constant 31 : i32
    %77 = tpu.dynamic_rotate %73 by %c31_i32_27 dim 0 : vector<32x128xf32>, i32 -> vector<32x128xf32>
    %cst_28 = arith.constant 0.000000e+00 : f32
    %78 = vector.broadcast %cst_28 : f32 to vector<32x128xf32>
    %79 = arith.select %20, %77, %78 : vector<32x128xi1>, vector<32x128xf32>
    %80 = tpu.concatenate %76, %73, %79 in 1 : vector<32x128xf32>, vector<32x128xf32>, vector<32x128xf32> -> vector<32x384xf32>
    %81 = arith.truncf %80 : vector<32x384xf32> to vector<32x384xbf16>
    %c1 = arith.constant 1 : index
    %c0_29 = arith.constant 0 : index
    %c0_30 = arith.constant 0 : index
    %82 = vector.load %arg1[%c1, %c0_29, %c0_30] : memref<3x384x128xbf16, #tpu.memory_space<vmem>>, vector<1x384x128xbf16>
    %83 = vector.shape_cast %82 : vector<1x384x128xbf16> to vector<384x128xbf16>
    %cst_31 = arith.constant dense<0.000000e+00> : vector<32x128xf32>
    %84 = tpu.matmul %81, %83, %cst_31 {dimension_numbers = #tpu.dot_dimension_numbers<[1], [0], [0], [1], [0, 0, 1, 1], [], []>} : vector<32x384xbf16>, vector<384x128xbf16>, vector<32x128xf32> -> vector<32x128xf32>
    %cst_32 = arith.constant dense<0.000000e+00> : vector<128xf32>
    %85 = vector.multi_reduction <add>, %84, %cst_32 [0] : vector<32x128xf32> to vector<128xf32>
    %86 = vector.shape_cast %85 : vector<128xf32> to vector<1x128xf32>
    %87 = arith.mulf %84, %84 : vector<32x128xf32>
    %cst_33 = arith.constant dense<0.000000e+00> : vector<128xf32>
    %88 = vector.multi_reduction <add>, %87, %cst_33 [0] : vector<32x128xf32> to vector<128xf32>
    %89 = vector.shape_cast %88 : vector<128xf32> to vector<1x128xf32>
    %90 = tpu.concatenate %86, %89 in 0 : vector<1x128xf32>, vector<1x128xf32> -> vector<2x128xf32>
    %c8_i32_34 = arith.constant 8 : i32
    %91 = tpu.dynamic_rotate %90 by %c8_i32_34 dim 1 : vector<2x128xf32>, i32 -> vector<2x128xf32>
    %92 = arith.addf %90, %91 : vector<2x128xf32>
    %c16_i32_35 = arith.constant 16 : i32
    %93 = tpu.dynamic_rotate %92 by %c16_i32_35 dim 1 : vector<2x128xf32>, i32 -> vector<2x128xf32>
    %94 = arith.addf %92, %93 : vector<2x128xf32>
    %c32_i32_36 = arith.constant 32 : i32
    %95 = tpu.dynamic_rotate %94 by %c32_i32_36 dim 1 : vector<2x128xf32>, i32 -> vector<2x128xf32>
    %96 = arith.addf %94, %95 : vector<2x128xf32>
    %c64_i32_37 = arith.constant 64 : i32
    %97 = tpu.dynamic_rotate %96 by %c64_i32_37 dim 1 : vector<2x128xf32>, i32 -> vector<2x128xf32>
    %98 = arith.addf %96, %97 : vector<2x128xf32>
    %99 = vector.extract_strided_slice %98 {offsets = [0, 0], sizes = [1, 128], strides = [1, 1]} : vector<2x128xf32> to vector<1x128xf32>
    %cst_38 = arith.constant 0.001953125 : f32
    %100 = vector.broadcast %cst_38 : f32 to vector<1x128xf32>
    %101 = arith.mulf %99, %100 : vector<1x128xf32>
    %102 = vector.extract_strided_slice %98 {offsets = [1, 0], sizes = [1, 128], strides = [1, 1]} : vector<2x128xf32> to vector<1x128xf32>
    %cst_39 = arith.constant 0.001953125 : f32
    %103 = vector.broadcast %cst_39 : f32 to vector<1x128xf32>
    %104 = arith.mulf %102, %103 : vector<1x128xf32>
    %105 = arith.mulf %101, %101 : vector<1x128xf32>
    %106 = arith.subf %104, %105 : vector<1x128xf32>
    %cst_40 = arith.constant 0.000000e+00 : f32
    %107 = vector.broadcast %cst_40 : f32 to vector<1x128xf32>
    %108 = arith.maximumf %106, %107 : vector<1x128xf32>
    %cst_41 = arith.constant 9.99999974E-6 : f32
    %109 = vector.broadcast %cst_41 : f32 to vector<1x128xf32>
    %110 = arith.addf %108, %109 : vector<1x128xf32>
    %111 = math.rsqrt %110 : vector<1x128xf32>
    %c1_42 = arith.constant 1 : index
    %c0_43 = arith.constant 0 : index
    %c0_44 = arith.constant 0 : index
    %112 = vector.load %arg2[%c1_42, %c0_43, %c0_44] : memref<3x1x128xf32, #tpu.memory_space<vmem>>, vector<1x1x128xf32>
    %113 = vector.shape_cast %112 : vector<1x1x128xf32> to vector<1x128xf32>
    %114 = arith.mulf %111, %113 : vector<1x128xf32>
    %115 = vector.broadcast %101 : vector<1x128xf32> to vector<32x128xf32>
    %116 = arith.subf %84, %115 : vector<32x128xf32>
    %117 = vector.broadcast %114 : vector<1x128xf32> to vector<32x128xf32>
    %118 = arith.mulf %116, %117 : vector<32x128xf32>
    %c1_45 = arith.constant 1 : index
    %c0_46 = arith.constant 0 : index
    %c0_47 = arith.constant 0 : index
    %119 = vector.load %arg3[%c1_45, %c0_46, %c0_47] : memref<3x1x128xf32, #tpu.memory_space<vmem>>, vector<1x1x128xf32>
    %120 = vector.shape_cast %119 : vector<1x1x128xf32> to vector<1x128xf32>
    %121 = vector.broadcast %120 : vector<1x128xf32> to vector<32x128xf32>
    %122 = arith.addf %118, %121 : vector<32x128xf32>
    %cst_48 = arith.constant 0.000000e+00 : f32
    %123 = vector.broadcast %cst_48 : f32 to vector<32x128xf32>
    %124 = arith.maximumf %122, %123 : vector<32x128xf32>
    %125 = arith.addf %73, %124 : vector<32x128xf32>
    %c1_i32_49 = arith.constant 1 : i32
    %126 = tpu.dynamic_rotate %125 by %c1_i32_49 dim 0 : vector<32x128xf32>, i32 -> vector<32x128xf32>
    %cst_50 = arith.constant 0.000000e+00 : f32
    %127 = vector.broadcast %cst_50 : f32 to vector<32x128xf32>
    %128 = arith.select %18, %126, %127 : vector<32x128xi1>, vector<32x128xf32>
    %c31_i32_51 = arith.constant 31 : i32
    %129 = tpu.dynamic_rotate %125 by %c31_i32_51 dim 0 : vector<32x128xf32>, i32 -> vector<32x128xf32>
    %cst_52 = arith.constant 0.000000e+00 : f32
    %130 = vector.broadcast %cst_52 : f32 to vector<32x128xf32>
    %131 = arith.select %20, %129, %130 : vector<32x128xi1>, vector<32x128xf32>
    %132 = tpu.concatenate %128, %125, %131 in 1 : vector<32x128xf32>, vector<32x128xf32>, vector<32x128xf32> -> vector<32x384xf32>
    %133 = arith.truncf %132 : vector<32x384xf32> to vector<32x384xbf16>
    %c2 = arith.constant 2 : index
    %c0_53 = arith.constant 0 : index
    %c0_54 = arith.constant 0 : index
    %134 = vector.load %arg1[%c2, %c0_53, %c0_54] : memref<3x384x128xbf16, #tpu.memory_space<vmem>>, vector<1x384x128xbf16>
    %135 = vector.shape_cast %134 : vector<1x384x128xbf16> to vector<384x128xbf16>
    %cst_55 = arith.constant dense<0.000000e+00> : vector<32x128xf32>
    %136 = tpu.matmul %133, %135, %cst_55 {dimension_numbers = #tpu.dot_dimension_numbers<[1], [0], [0], [1], [0, 0, 1, 1], [], []>} : vector<32x384xbf16>, vector<384x128xbf16>, vector<32x128xf32> -> vector<32x128xf32>
    %cst_56 = arith.constant dense<0.000000e+00> : vector<128xf32>
    %137 = vector.multi_reduction <add>, %136, %cst_56 [0] : vector<32x128xf32> to vector<128xf32>
    %138 = vector.shape_cast %137 : vector<128xf32> to vector<1x128xf32>
    %139 = arith.mulf %136, %136 : vector<32x128xf32>
    %cst_57 = arith.constant dense<0.000000e+00> : vector<128xf32>
    %140 = vector.multi_reduction <add>, %139, %cst_57 [0] : vector<32x128xf32> to vector<128xf32>
    %141 = vector.shape_cast %140 : vector<128xf32> to vector<1x128xf32>
    %142 = tpu.concatenate %138, %141 in 0 : vector<1x128xf32>, vector<1x128xf32> -> vector<2x128xf32>
    %c8_i32_58 = arith.constant 8 : i32
    %143 = tpu.dynamic_rotate %142 by %c8_i32_58 dim 1 : vector<2x128xf32>, i32 -> vector<2x128xf32>
    %144 = arith.addf %142, %143 : vector<2x128xf32>
    %c16_i32_59 = arith.constant 16 : i32
    %145 = tpu.dynamic_rotate %144 by %c16_i32_59 dim 1 : vector<2x128xf32>, i32 -> vector<2x128xf32>
    %146 = arith.addf %144, %145 : vector<2x128xf32>
    %c32_i32_60 = arith.constant 32 : i32
    %147 = tpu.dynamic_rotate %146 by %c32_i32_60 dim 1 : vector<2x128xf32>, i32 -> vector<2x128xf32>
    %148 = arith.addf %146, %147 : vector<2x128xf32>
    %c64_i32_61 = arith.constant 64 : i32
    %149 = tpu.dynamic_rotate %148 by %c64_i32_61 dim 1 : vector<2x128xf32>, i32 -> vector<2x128xf32>
    %150 = arith.addf %148, %149 : vector<2x128xf32>
    %151 = vector.extract_strided_slice %150 {offsets = [0, 0], sizes = [1, 128], strides = [1, 1]} : vector<2x128xf32> to vector<1x128xf32>
    %cst_62 = arith.constant 0.001953125 : f32
    %152 = vector.broadcast %cst_62 : f32 to vector<1x128xf32>
    %153 = arith.mulf %151, %152 : vector<1x128xf32>
    %154 = vector.extract_strided_slice %150 {offsets = [1, 0], sizes = [1, 128], strides = [1, 1]} : vector<2x128xf32> to vector<1x128xf32>
    %cst_63 = arith.constant 0.001953125 : f32
    %155 = vector.broadcast %cst_63 : f32 to vector<1x128xf32>
    %156 = arith.mulf %154, %155 : vector<1x128xf32>
    %157 = arith.mulf %153, %153 : vector<1x128xf32>
    %158 = arith.subf %156, %157 : vector<1x128xf32>
    %cst_64 = arith.constant 0.000000e+00 : f32
    %159 = vector.broadcast %cst_64 : f32 to vector<1x128xf32>
    %160 = arith.maximumf %158, %159 : vector<1x128xf32>
    %cst_65 = arith.constant 9.99999974E-6 : f32
    %161 = vector.broadcast %cst_65 : f32 to vector<1x128xf32>
    %162 = arith.addf %160, %161 : vector<1x128xf32>
    %163 = math.rsqrt %162 : vector<1x128xf32>
    %c2_66 = arith.constant 2 : index
    %c0_67 = arith.constant 0 : index
    %c0_68 = arith.constant 0 : index
    %164 = vector.load %arg2[%c2_66, %c0_67, %c0_68] : memref<3x1x128xf32, #tpu.memory_space<vmem>>, vector<1x1x128xf32>
    %165 = vector.shape_cast %164 : vector<1x1x128xf32> to vector<1x128xf32>
    %166 = arith.mulf %163, %165 : vector<1x128xf32>
    %167 = vector.broadcast %153 : vector<1x128xf32> to vector<32x128xf32>
    %168 = arith.subf %136, %167 : vector<32x128xf32>
    %169 = vector.broadcast %166 : vector<1x128xf32> to vector<32x128xf32>
    %170 = arith.mulf %168, %169 : vector<32x128xf32>
    %c2_69 = arith.constant 2 : index
    %c0_70 = arith.constant 0 : index
    %c0_71 = arith.constant 0 : index
    %171 = vector.load %arg3[%c2_69, %c0_70, %c0_71] : memref<3x1x128xf32, #tpu.memory_space<vmem>>, vector<1x1x128xf32>
    %172 = vector.shape_cast %171 : vector<1x1x128xf32> to vector<1x128xf32>
    %173 = vector.broadcast %172 : vector<1x128xf32> to vector<32x128xf32>
    %174 = arith.addf %170, %173 : vector<32x128xf32>
    %cst_72 = arith.constant 0.000000e+00 : f32
    %175 = vector.broadcast %cst_72 : f32 to vector<32x128xf32>
    %176 = arith.maximumf %174, %175 : vector<32x128xf32>
    %c0_73 = arith.constant 0 : index
    %c0_74 = arith.constant 0 : index
    %177 = vector.load %arg4[%c0_73, %c0_74] : memref<32x128xf32, #tpu.memory_space<vmem>>, vector<32x128xf32>
    tpu.vector_store %arg4[%c0_73, %c0_74], %176 {strides = array<i32>} : memref<32x128xf32, #tpu.memory_space<vmem>>, vector<32x128xf32>,
    return
  }
}

</mosaic_0001>

<bundles_post_ra>
// kernel: bottleneck_forward.1
= control target key start
LH: loop header
LB: loop body
LE: loop exit
PB: predicated region body
PF: predicated region fallthrough
CT: control target
= control target key end

     0   :  { %v17_v12 = vlaneseq  ;;  %vm1705_vm4 = vmmov 1   ;;  %vm385_vm11 = vcmask 1040384   ;;  %s1706_s18 = smov 8   ;;  %s1707_s19 = smov 16   ;;  %s2222_s1 = inlined_call_operand.vmem [shape: bf16[3,384,128], index: 1, kind: input, shape index: {}]   ;;  %s2223_s0 = inlined_call_operand.vmem [shape: f32[32,128], index: 0, kind: input, shape index: {}]   ;;  %s2224_s2 = inlined_call_operand.vmem [shape: f32[3,1,128], index: 2, kind: input, shape index: {}]   ;;  %s2225_s3 = inlined_call_operand.vmem [shape: f32[3,1,128], index: 3, kind: input, shape index: {}]   ;;  %s2226_s4 = inlined_call_operand.vmem [shape: f32[32,128], index: 4, kind: output, shape index: {}]  }
   0x1   :  { %v1615_v0 = vld [vmem:[%s2222_s1 + $0x38] sm:$0xff]  ;;  %v1614_v3 = vld [vmem:[%s2222_s1 + $0x30] sm:$0xff]  ;;  %v1613_v6 = vld [vmem:[%s2222_s1 + $0x28] sm:$0xff]  ;;  %s1708_s20 = smov 32   ;;  %s1709_s21 = smov 64  }
   0x2   :  { %v1623_v1 = vld [vmem:[%s2222_s1 + $0x78] sm:$0xff]  ;;  %306 = vmatpush.bf16.msra.mxu0 %v1615_v0  ;;  %v1622_v4 = vld [vmem:[%s2222_s1 + $0x70] sm:$0xff]  ;;  %v1621_v7 = vld [vmem:[%s2222_s1 + $0x68] sm:$0xff]  ;;  %v1780_v16 = vshrl.u32 %v17_v12, 7 }
   0x3   :  { %v1631_v2 = vld [vmem:[%s2222_s1 + $0xb8] sm:$0xff]  ;;  %325 = vmatpush.bf16.msra.mxu1 %v1623_v1  ;;  %v1630_v5 = vld [vmem:[%s2222_s1 + $0xb0] sm:$0xff]  ;;  %v1629_v8 = vld [vmem:[%s2222_s1 + $0xa8] sm:$0xff] }
   0x4   :  { %344 = vmatpush.bf16.msra.mxu2 %v1631_v2  ;;  %v1612_v9 = vld [vmem:[%s2222_s1 + $0x20] sm:$0xff]  ;;  %v1611_v13 = vld [vmem:[%s2222_s1 + $0x18] sm:$0xff]  ;;  %v1610_v17 = vld [vmem:[%s2222_s1 + $0x10] sm:$0xff]  ;;  %v19_v23 = vadd.s32 8, %v1780_v16  ;;  %v26_v27 = vand.u32 15, %v1780_v16  ;;  %vm86_vm0 = vcmp.lt.s32.totalorder %v1780_v16, 1 }
   0x5   :  { %v1620_v10 = vld [vmem:[%s2222_s1 + $0x60] sm:$0xff]  ;;  %v1619_v14 = vld [vmem:[%s2222_s1 + $0x58] sm:$0xff]  ;;  %v1618_v18 = vld [vmem:[%s2222_s1 + $0x50] sm:$0xff]  ;;  %vm99_vm1 = vcmp.lt.s32.totalorder %v1780_v16, 7  ;;  %v20_v48 = vadd.s32 16, %v1780_v16  ;;  %v21_v49 = vadd.s32 24, %v1780_v16 }
   0x6   :  { %307 = vmatpush.bf16.msra.mxu0 %v1614_v3  ;;  %v1628_v11 = vld [vmem:[%s2222_s1 + $0xa0] sm:$0xff]  ;;  %v1627_v15 = vld [vmem:[%s2222_s1 + $0x98] sm:$0xff]  ;;  %v1626_v19 = vld [vmem:[%s2222_s1 + $0x90] sm:$0xff]  ;;  %v33_v35 = vand.u32 15, %v19_v23  ;;  %vm70_vm2 = vcmp.ne.s32.totalorder %v26_v27, 0 }
   0x7   :  { %326 = vmatpush.bf16.msra.mxu1 %v1622_v4  ;;  %v1794_v20 = vld [vmem:[%s2223_s0] sm:$0xff]  ;;  %v1799_v21 = vld [vmem:[%s2223_s0 + $0x8] sm:$0xff]  ;;  %v1804_v22 = vld [vmem:[%s2223_s0 + $0x18] sm:$0xff]  ;;  %v40_v51 = vand.u32 15, %v20_v48  ;;  %v47_v53 = vand.u32 15, %v21_v49 }
   0x8   :  { %345 = vmatpush.bf16.msra.mxu2 %v1630_v5  ;;  %v1810_v24 = vld [vmem:[%s2223_s0 + $0x10] sm:$0xff]  ;;  %v1609_v25 = vld [vmem:[%s2222_s1 + $0x8] sm:$0xff]  ;;  %v82_v28 = vrot.slane %v1794_v20, 7  ;;  %v83_v29 = vrot.slane %v1799_v21, 7  ;;  %v85_v30 = vrot.slane %v1804_v22, 7  ;;  %v95_v32 = vrot.slane %v1794_v20, 1  ;;  %vm1850_vm5 = vmpackc.low %vm1705_vm4, %vm70_vm2 }
   0x9   :  { %v1617_v26 = vld [vmem:[%s2222_s1 + $0x48] sm:$0xff]  ;;  %v96_v33 = vrot.slane %v1799_v21, 1  ;;  %v97_v34 = vrot.slane %v1810_v24, 1  ;;  %v1608_v36 = vld [vmem:[%s2222_s1] sm:$0xff]  ;;  %vm75_vm3 = vcmp.ne.s32.totalorder %v33_v35, 15  ;;  %v109_v44 = vpack.c.bf16 %v1799_v21, %v1794_v20 }
   0xa   :  { %308 = vmatpush.bf16.msra.mxu0 %v1613_v6  ;;  %v1625_v31 = vld [vmem:[%s2222_s1 + $0x88] sm:$0xff]  ;;  %v1616_v37 = vld [vmem:[%s2222_s1 + $0x40] sm:$0xff]  ;;  %v89_v38 = vsel %vm86_vm0, %v82_v28, %v83_v29  ;;  %v90_v39 = vsel %vm86_vm0, %v85_v30, %v82_v28  ;;  %vm1855_vm6 = vmpackc.low %vm75_vm3, %vm1705_vm4  ;;  %v84_v50 = vrot.slane %v1810_v24, 7  ;;  %v98_v52 = vrot.slane %v1804_v22, 1 }
   0xb   :  { %327 = vmatpush.bf16.msra.mxu1 %v1621_v7  ;;  %v1624_v40 = vld [vmem:[%s2222_s1 + $0x80] sm:$0xff]  ;;  %v101_v41 = vsel %vm99_vm1, %v96_v33, %v97_v34  ;;  %v102_v42 = vsel %vm99_vm1, %v95_v32, %v96_v33  ;;  %v1281_v43 = vpack.c.bf16 %v89_v38, %v90_v39  ;;  %vm72_vm7 = vcmp.ne.s32.totalorder %v40_v51, 0 }
   0xc   :  { %346 = vmatpush.bf16.msra.mxu2 %v1629_v8  ;;  %v1287_v46 = vpack.c.bf16 %v101_v41, %v102_v42  ;;  %v87_v54 = vsel %vm86_vm0, %v84_v50, %v85_v30  ;;  %v88_v55 = vsel %vm86_vm0, %v83_v29, %v84_v50  ;;  %v100_v56 = vsel %vm99_vm1, %v97_v34, %v98_v52  ;;  %vm1878_vm9 = vmpackc.low %vm1705_vm4, %vm72_vm7 }
   0xd   :  { %v103_v57 = vsel %vm99_vm1, %v98_v52, %v95_v32  ;;  %vm77_vm8 = vcmp.ne.s32.totalorder %v47_v53, 15  ;;  %v1284_v58 = vpack.c.bf16 %v87_v54, %v88_v55  ;;  %v112_v59 = vpack.c.bf16 %v1804_v22, %v1810_v24  ;;  %v1647_v55 = vld [vmem:[%s2222_s1 + $0x138] sm:$0xff] }
   0xe   :  { %309 = vmatpush.bf16.msra.mxu0 %v1612_v9  ;;  %v1290_v61 = vpack.c.bf16 %v103_v57, %v100_v56  ;;  %vm1883_vm10 = vmpackc.low %vm77_vm8, %vm1705_vm4  ;;  %v1639_v56 = vld [vmem:[%s2222_s1 + $0xf8] sm:$0xff] }
   0xf   :  { %328 = vmatpush.bf16.msra.mxu1 %v1620_v10  ;;  %v1655_v57 = vld [vmem:[%s2222_s1 + $0x178] sm:$0xff]  ;;  %671 = vmatpush.bf16.msra.mxu3 %v1639_v56 }
  0x10   :  { %347 = vmatpush.bf16.msra.mxu2 %v1628_v11 }
  0x12   :  { %310 = vmatpush.bf16.msra.mxu0 %v1611_v13 }
  0x13   :  { %329 = vmatpush.bf16.msra.mxu1 %v1619_v14 }
  0x14   :  { %348 = vmatpush.bf16.msra.mxu2 %v1627_v15 }
  0x16   :  { %311 = vmatpush.bf16.msra.mxu0 %v1610_v17 }
  0x17   :  { %330 = vmatpush.bf16.msra.mxu1 %v1618_v18 }
  0x18   :  { %349 = vmatpush.bf16.msra.mxu2 %v1626_v19 }
  0x1a   :  { %312 = vmatpush.bf16.msra.mxu0 %v1609_v25 }
  0x1b   :  { %331 = vmatpush.bf16.msra.mxu1 %v1617_v26 }
  0x1c   :  { %350 = vmatpush.bf16.msra.mxu2 %v1625_v31 }
  0x1e   :  { %313 = vmatpush.bf16.msra.mxu0 %v1608_v36 }
  0x1f   :  { %332 = vmatpush.bf16.msra.mxu1 %v1616_v37 }
  0x20   :  { %351 = vmatpush.bf16.msra.mxu2 %v1624_v40 }
  0x21   :  { %1282 = vmatmul.msk.bf16.vlgmr.msra.gmra.mxu0 %vm1850_vm5, %v1281_v43 }
  0x22   :  { %333 = vmatmul.bf16.vlgmr.msra.gmra.mxu1 %v109_v44  ;;  %690 = vmatpush.bf16.msrb.mxu0 %v1647_v55 }
  0x23   :  { %1288 = vmatmul.msk.bf16.vlgmr.msra.gmra.mxu2 %vm1855_vm6, %v1287_v46  ;;  %709 = vmatpush.bf16.msrb.mxu1 %v1655_v57 }
  0x31   :  { %1285 = vmatmul.msk.bf16.gmra.mxu0 %vm1878_vm9, %v1284_v58  ;;  %v1646_v58 = vld [vmem:[%s2222_s1 + $0x130] sm:$0xff] }
  0x32   :  { %338 = vmatmul.bf16.gmra.mxu1 %v112_v59  ;;  %691 = vmatpush.bf16.msrb.mxu0 %v1646_v58  ;;  %v1638_v59 = vld [vmem:[%s2222_s1 + $0xf0] sm:$0xff] }
  0x33   :  { %1291 = vmatmul.msk.bf16.gmra.mxu2 %vm1883_vm10, %v1290_v61  ;;  %v1654_v61 = vld [vmem:[%s2222_s1 + $0x170] sm:$0xff]  ;;  %672 = vmatpush.bf16.msra.mxu3 %v1638_v59 }
  0x34   :  { %710 = vmatpush.bf16.msrb.mxu1 %v1654_v61 }
  0x9e   :  { %v315_v63 = vpop.f32.mrf.mxu0 }
  0x9f   :  { %v334_v0 = vpop.f32.mrf.mxu1 }
  0xa0   :  { %v335_v7 = vadd.f32 %v334_v0, %v315_v63  ;;  %v1645_v63 = vld [vmem:[%s2222_s1 + $0x128] sm:$0xff] }
  0xa1   :  { %692 = vmatpush.bf16.msrb.mxu0 %v1645_v63  ;;  %v1637_v0 = vld [vmem:[%s2222_s1 + $0xe8] sm:$0xff] }
  0xa2   :  { %673 = vmatpush.bf16.msra.mxu3 %v1637_v0 }
  0xa6   :  { %v353_v1 = vpop.f32.mrf.mxu2  ;;  %v317_v2 = vpop.f32.mrf.mxu0 }
  0xa7   :  { %v336_v3 = vpop.f32.mrf.mxu1  ;;  %v1893_v12 = vadd.f32 %v353_v1, %v335_v7  ;;  %v1653_v1 = vld [vmem:[%s2222_s1 + $0x168] sm:$0xff] }
  0xa8   :  { %v337_v8 = vadd.f32 %v336_v3, %v317_v2  ;;  %v1644_v2 = vld [vmem:[%s2222_s1 + $0x120] sm:$0xff]  ;;  %711 = vmatpush.bf16.msrb.mxu1 %v1653_v1 }
  0xa9   :  { %v372_v18 = vmul.f32 %v1893_v12, %v1893_v12  ;;  %693 = vmatpush.bf16.msrb.mxu0 %v1644_v2  ;;  %v1636_v3 = vld [vmem:[%s2222_s1 + $0xe0] sm:$0xff] }
  0xaa   :  { %674 = vmatpush.bf16.msra.mxu3 %v1636_v3 }
  0xae   :  { %v355_v4 = vpop.f32.mrf.mxu2  ;;  %v320_v5 = vpop.f32.mrf.mxu0 }
  0xaf   :  { %v339_v6 = vpop.f32.mrf.mxu1  ;;  %v1891_v11 = vadd.f32 %v355_v4, %v337_v8  ;;  %v1652_v4 = vld [vmem:[%s2222_s1 + $0x160] sm:$0xff]  ;;  %v1635_v8 = vld [vmem:[%s2222_s1 + $0xd8] sm:$0xff] }
  0xb0   :  { %v340_v9 = vadd.f32 %v339_v6, %v320_v5  ;;  %v1643_v5 = vld [vmem:[%s2222_s1 + $0x118] sm:$0xff]  ;;  %712 = vmatpush.bf16.msrb.mxu1 %v1652_v4  ;;  %675 = vmatpush.bf16.msra.mxu3 %v1635_v8 }
  0xb1   :  { %v373_v17 = vmul.f32 %v1891_v11, %v1891_v11  ;;  %v363_v19 = vadd.f32 %v1891_v11, %v1893_v12  ;;  %694 = vmatpush.bf16.msrb.mxu0 %v1643_v5 }
  0xb3   :  { %v376_v27 = vadd.f32 %v373_v17, %v372_v18  ;;  %v1634_v17 = vld [vmem:[%s2222_s1 + $0xd0] sm:$0xff] }
  0xb4   :  { %v1650_v18 = vld [vmem:[%s2222_s1 + $0x150] sm:$0xff]  ;;  %676 = vmatpush.bf16.msra.mxu3 %v1634_v17 }
  0xb6   :  { %v358_v10 = vpop.f32.mrf.mxu2  ;;  %v322_v14 = vpop.f32.mrf.mxu0 }
  0xb7   :  { %v1895_v13 = vadd.f32 %v358_v10, %v340_v9  ;;  %v341_v15 = vpop.f32.mrf.mxu1  ;;  %v1651_v9 = vld [vmem:[%s2222_s1 + $0x158] sm:$0xff] }
  0xb8   :  { %v342_v25 = vadd.f32 %v341_v15, %v322_v14  ;;  %v1642_v14 = vld [vmem:[%s2222_s1 + $0x110] sm:$0xff]  ;;  %713 = vmatpush.bf16.msrb.mxu1 %v1651_v9 }
  0xb9   :  { %v374_v23 = vmul.f32 %v1895_v13, %v1895_v13  ;;  %v364_v28 = vadd.f32 %v363_v19, %v1895_v13  ;;  %695 = vmatpush.bf16.msrb.mxu0 %v1642_v14 }
  0xbb   :  { %v377_v30 = vadd.f32 %v376_v27, %v374_v23  ;;  %v1641_v23 = vld [vmem:[%s2222_s1 + $0x108] sm:$0xff] }
  0xbc   :  { %714 = vmatpush.bf16.msrb.mxu1 %v1650_v18  ;;  %v1649_v27 = vld [vmem:[%s2222_s1 + $0x148] sm:$0xff] }
  0xbd   :  { %696 = vmatpush.bf16.msrb.mxu0 %v1641_v23 }
  0xbe   :  { %v360_v26 = vpop.f32.mrf.mxu2 }
  0xbf   :  { %v1906_v29 = vadd.f32 %v360_v26, %v342_v25  ;;  %v1633_v26 = vld [vmem:[%s2222_s1 + $0xc8] sm:$0xff] }
  0xc0   :  { %677 = vmatpush.bf16.msra.mxu3 %v1633_v26  ;;  %715 = vmatpush.bf16.msrb.mxu1 %v1649_v27 }
  0xc1   :  { %v365_v31 = vadd.f32 %v364_v28, %v1906_v29  ;;  %v375_v32 = vmul.f32 %v1906_v29, %v1906_v29 }
  0xc3   :  { %v366_v33 = vrot.slane %v365_v31, 4  ;;  %v378_v34 = vadd.f32 %v377_v30, %v375_v32  ;;  %v1640_v30 = vld [vmem:[%s2222_s1 + $0x100] sm:$0xff] }
  0xc4   :  { %697 = vmatpush.bf16.msrb.mxu0 %v1640_v30 }
  0xc5   :  { %v367_v35 = vadd.f32 %v366_v33, %v365_v31  ;;  %v379_v36 = vrot.slane %v378_v34, 4  ;;  %v1632_v31 = vld [vmem:[%s2222_s1 + $0xc0] sm:$0xff] }
  0xc6   :  { %v1648_v33 = vld [vmem:[%s2222_s1 + $0x140] sm:$0xff]  ;;  %678 = vmatpush.bf16.msra.mxu3 %v1632_v31 }
  0xc7   :  { %v368_v37 = vrot.slane %v367_v35, 2  ;;  %v380_v38 = vadd.f32 %v379_v36, %v378_v34  ;;  %716 = vmatpush.bf16.msrb.mxu1 %v1648_v33 }
  0xc9   :  { %v369_v39 = vadd.f32 %v368_v37, %v367_v35  ;;  %v381_v40 = vrot.slane %v380_v38, 2 }
  0xcb   :  { %v370_v41 = vrot.slane %v369_v39, 1  ;;  %v382_v42 = vadd.f32 %v381_v40, %v380_v38 }
  0xcd   :  { %v383_v43 = vrot.slane %v382_v42, 1  ;;  %v371_v44 = vadd.f32 %v370_v41, %v369_v39  ;;  %v1693_v39 = vld [vmem:[%s2224_s2] ss:$0 sm:$0xff] }
  0xcf   :  { %v384_v46 = vadd.f32 %v383_v43, %v382_v42 }
  0xd1   :  { %v386_v48 = vsel %vm385_vm11, %v371_v44, %v384_v46  ;;  %v1694_v46 = vld [vmem:[%s2225_s3] ss:$0 sm:$0xff] }
  0xd2   :  { %387 = vrot.lane.b32.xlu0 %v386_v48, %s1706_s18 }
 0x144   :  { %v388_v49 = vpop.permute.xlu0 %387 }
 0x145   :  { %v389_v50 = vadd.f32 %v388_v49, %v386_v48 }
 0x147   :  { %390 = vrot.lane.b32.xlu0 %v389_v50, %s1707_s19 }
 0x1b9   :  { %v391_v51 = vpop.permute.xlu0 %390 }
 0x1ba   :  { %v392_v52 = vadd.f32 %v391_v51, %v389_v50 }
 0x1bc   :  { %393 = vrot.lane.b32.xlu1 %v392_v52, %s1708_s20 }
 0x22e   :  { %v394_v53 = vpop.permute.xlu1 %393 }
 0x22f   :  { %v395_v54 = vadd.f32 %v394_v53, %v392_v52 }
 0x231   :  { %396 = vrot.lane.b32.xlu1 %v395_v54, %s1709_s21 }
 0x2a3   :  { %v397_v6 = vpop.permute.xlu1 %396 }
 0x2a4   :  { %v398_v7 = vadd.f32 %v397_v6, %v395_v54 }
 0x2a6   :  { %v399_v10 = vmul.f32 0.001953125, %v398_v7 }
 0x2a8   :  { %v400_v15 = vmul.f32 %v399_v10, %v399_v10  ;;  %v422_v41 = vperm.slane %v399_v10, 0 }
 0x2aa   :  { %v402_v19 = vrot.slane %v400_v15, 7  ;;  %v423_v44 = vsub.f32 %v1893_v12, %v422_v41  ;;  %v424_v48 = vsub.f32 %v1891_v11, %v422_v41  ;;  %v425_v49 = vsub.f32 %v1895_v13, %v422_v41 }
 0x2ab   :  { %v426_v50 = vsub.f32 %v1906_v29, %v422_v41 }
 0x2ac   :  { %v404_v25 = vsub.f32 %v399_v10, %v402_v19 }
 0x2ae   :  { %v405_v28 = vmax.f32 %v404_v25, 0.0 }
 0x2b0   :  { %v406_v32 = vadd.f32 1e-05, %v405_v28 }
 0x2b2   :  { %1699 = vrsqrt.f32 %v406_v32  ;;  %vm413_vm13 = vweird.f32 %v406_v32 }
 0x2b8   :  { %v1700_v34 = vpop.eup %1699 }
 0x2b9   :  { %v408_v35 = vmul.f32 %v1700_v34, %v406_v32  ;;  %vm414_vm12 = vweird.f32 %v1700_v34 }
 0x2ba   :  { %vm415_vm14 = vmor %vm413_vm13, %vm414_vm12 }
 0x2bb   :  { %v409_v36 = vmul.f32 %v1700_v34, %v408_v35 }
 0x2bd   :  { %v410_v37 = vmul.f32 0.5, %v409_v36 }
 0x2bf   :  { %v411_v38 = vsub.f32 1.5, %v410_v37 }
 0x2c1   :  { %v412_v40 = vmul.f32 %v1700_v34, %v411_v38 }
 0x2c3   :  { %v416_v42 = vsel %vm415_vm14, %v1700_v34, %v412_v40 }
 0x2c4   :  { %v421_v43 = vmul.f32 %v1693_v39, %v416_v42 }
 0x2c6   :  { %v427_v51 = vperm.slane %v421_v43, 1 }
 0x2c8   :  { %v428_v52 = vmul.f32 %v427_v51, %v423_v44  ;;  %v429_v53 = vmul.f32 %v427_v51, %v424_v48  ;;  %v430_v54 = vmul.f32 %v427_v51, %v425_v49  ;;  %v431_v55 = vmul.f32 %v427_v51, %v426_v50 }
 0x2ca   :  { %v438_v56 = vadd.f32 %v1694_v46, %v430_v54  ;;  %v439_v57 = vadd.f32 %v1694_v46, %v431_v55  ;;  %v436_v58 = vadd.f32 %v1694_v46, %v428_v52  ;;  %v437_v59 = vadd.f32 %v1694_v46, %v429_v53 }
 0x2cc   :  { %v442_v12 = vmax.f32 %v438_v56, 0.0  ;;  %v443_v61 = vmax.f32 %v439_v57, 0.0  ;;  %v440_v63 = vmax.f32 %v436_v58, 0.0  ;;  %v441_v0 = vmax.f32 %v437_v59, 0.0 }
 0x2ce   :  { %v1999_v1 = vadd.f32 %v442_v12, %v1810_v24  ;;  %v2002_v11 = vadd.f32 %v440_v63, %v1794_v20  ;;  %v2005_v13 = vadd.f32 %v441_v0, %v1799_v21  ;;  %v2008_v29 = vadd.f32 %v443_v61, %v1804_v22 }
 0x2d0   :  { %v473_v2 = vpack.c.bf16 %v2005_v13, %v2002_v11  ;;  %v448_v3 = vrot.slane %v2002_v11, 7  ;;  %v449_v4 = vrot.slane %v2005_v13, 7  ;;  %v451_v5 = vrot.slane %v2008_v29, 7 }
 0x2d1   :  { %v460_v24 = vrot.slane %v2002_v11, 1  ;;  %v461_v20 = vrot.slane %v2005_v13, 1  ;;  %v462_v6 = vrot.slane %v1999_v1, 1  ;;  %v450_v14 = vrot.slane %v1999_v1, 7 }
 0x2d2   :  { %698 = vmatmul.bf16.vlgmr.msrb.gmra.mxu0 %v473_v2  ;;  %v454_v21 = vsel %vm86_vm0, %v448_v3, %v449_v4  ;;  %v455_v22 = vsel %vm86_vm0, %v451_v5, %v448_v3  ;;  %v463_v15 = vrot.slane %v2008_v29, 1  ;;  %v476_v17 = vpack.c.bf16 %v2008_v29, %v1999_v1 }
 0x2d3   :  { %v1437_v7 = vpack.c.bf16 %v454_v21, %v455_v22  ;;  %v465_v8 = vsel %vm99_vm1, %v461_v20, %v462_v6  ;;  %v466_v9 = vsel %vm99_vm1, %v460_v24, %v461_v20  ;;  %v452_v18 = vsel %vm86_vm0, %v450_v14, %v451_v5 }
 0x2d4   :  { %v1443_v10 = vpack.c.bf16 %v465_v8, %v466_v9  ;;  %v453_v19 = vsel %vm86_vm0, %v449_v4, %v450_v14  ;;  %v464_v23 = vsel %vm99_vm1, %v462_v6, %v463_v15  ;;  %v467_v25 = vsel %vm99_vm1, %v463_v15, %v460_v24 }
 0x2d5   :  { %1438 = vmatmul.msk.bf16.vlgmr.msra.gmra.mxu3 %vm1850_vm5, %v1437_v7  ;;  %v1440_v26 = vpack.c.bf16 %v452_v18, %v453_v19  ;;  %v1446_v27 = vpack.c.bf16 %v467_v25, %v464_v23  ;;  %v1671_v18 = vld [vmem:[%s2222_s1 + $0x1f8] sm:$0xff]  ;;  %v1670_v25 = vld [vmem:[%s2222_s1 + $0x1f0] sm:$0xff] }
 0x2d6   :  { %1444 = vmatmul.msk.bf16.vlgmr.msrb.gmra.mxu1 %vm1855_vm6, %v1443_v10  ;;  %1056 = vmatpush.bf16.msrb.mxu3 %v1671_v18  ;;  %v1663_v19 = vld [vmem:[%s2222_s1 + $0x1b8] sm:$0xff] }
 0x2d7   :  { %v1679_v23 = vld [vmem:[%s2222_s1 + $0x238] sm:$0xff]  ;;  %1037 = vmatpush.bf16.msrb.mxu2 %v1663_v19 }
 0x2d8   :  { %1075 = vmatpush.bf16.msra.mxu0 %v1679_v23  ;;  %1680 = vmatpush.bf16.msra.mxu1 %v1679_v23 }
 0x2da   :  { %1057 = vmatpush.bf16.msrb.mxu3 %v1670_v25 }
 0x2e2   :  { %703 = vmatmul.bf16.gmra.mxu0 %v476_v17 }
 0x2e5   :  { %1441 = vmatmul.msk.bf16.gmra.mxu3 %vm1878_vm9, %v1440_v26  ;;  %v1662_v26 = vld [vmem:[%s2222_s1 + $0x1b0] sm:$0xff] }
 0x2e6   :  { %1447 = vmatmul.msk.bf16.gmra.mxu1 %vm1883_vm10, %v1446_v27  ;;  %v1678_v27 = vld [vmem:[%s2222_s1 + $0x230] sm:$0xff]  ;;  %1038 = vmatpush.bf16.msrb.mxu2 %v1662_v26 }
 0x2e7   :  { %1076 = vmatpush.bf16.msra.mxu0 %v1678_v27  ;;  %1681 = vmatpush.bf16.msra.mxu1 %v1678_v27 }
 0x34f   :  { %v699_v28 = vpop.f32.mrf.mxu0 }
 0x353   :  { %v718_v30 = vpop.f32.mrf.mxu1 }
 0x357   :  { %v701_v32 = vpop.f32.mrf.mxu0 }
 0x358   :  { %v680_v31 = vpop.f32.mrf.mxu3 }
 0x359   :  { %v700_v39 = vadd.f32 %v699_v28, %v680_v31  ;;  %v1669_v28 = vld [vmem:[%s2222_s1 + $0x1e8] sm:$0xff] }
 0x35a   :  { %1058 = vmatpush.bf16.msrb.mxu3 %v1669_v28  ;;  %v1677_v31 = vld [vmem:[%s2222_s1 + $0x228] sm:$0xff] }
 0x35b   :  { %v720_v33 = vpop.f32.mrf.mxu1  ;;  %v2048_v42 = vadd.f32 %v718_v30, %v700_v39  ;;  %v1661_v30 = vld [vmem:[%s2222_s1 + $0x1a8] sm:$0xff]  ;;  %1077 = vmatpush.bf16.msra.mxu0 %v1677_v31  ;;  %1682 = vmatpush.bf16.msra.mxu1 %v1677_v31  ;;  %v1659_v39 = vld [vmem:[%s2222_s1 + $0x198] sm:$0xff] }
 0x35c   :  { %1039 = vmatpush.bf16.msrb.mxu2 %v1661_v30 }
 0x35d   :  { %v737_v49 = vmul.f32 %v2048_v42, %v2048_v42 }
 0x35f   :  { %v704_v35 = vpop.f32.mrf.mxu0 }
 0x360   :  { %v682_v34 = vpop.f32.mrf.mxu3 }
 0x361   :  { %v702_v36 = vadd.f32 %v701_v32, %v682_v34  ;;  %v1668_v32 = vld [vmem:[%s2222_s1 + $0x1e0] sm:$0xff] }
 0x362   :  { %1059 = vmatpush.bf16.msrb.mxu3 %v1668_v32  ;;  %v1660_v34 = vld [vmem:[%s2222_s1 + $0x1a0] sm:$0xff] }
 0x363   :  { %v723_v37 = vpop.f32.mrf.mxu1  ;;  %v2046_v41 = vadd.f32 %v720_v33, %v702_v36  ;;  %1040 = vmatpush.bf16.msrb.mxu2 %v1660_v34 }
 0x365   :  { %v738_v44 = vmul.f32 %v2046_v41, %v2046_v41  ;;  %v728_v50 = vadd.f32 %v2046_v41, %v2048_v42 }
 0x367   :  { %v706_v46 = vpop.f32.mrf.mxu0  ;;  %v741_v54 = vadd.f32 %v738_v44, %v737_v49  ;;  %1041 = vmatpush.bf16.msrb.mxu2 %v1659_v39  ;;  %v1658_v49 = vld [vmem:[%s2222_s1 + $0x190] sm:$0xff] }
 0x368   :  { %v685_v38 = vpop.f32.mrf.mxu3 }
 0x369   :  { %v705_v40 = vadd.f32 %v704_v35, %v685_v38  ;;  %v1676_v35 = vld [vmem:[%s2222_s1 + $0x220] sm:$0xff] }
 0x36a   :  { %1078 = vmatpush.bf16.msra.mxu0 %v1676_v35  ;;  %1683 = vmatpush.bf16.msra.mxu1 %v1676_v35 }
 0x36b   :  { %v2050_v43 = vadd.f32 %v723_v37, %v705_v40  ;;  %v725_v53 = vpop.f32.mrf.mxu1  ;;  %v1667_v37 = vld [vmem:[%s2222_s1 + $0x1d8] sm:$0xff]  ;;  %1042 = vmatpush.bf16.msrb.mxu2 %v1658_v49 }
 0x36c   :  { %1060 = vmatpush.bf16.msrb.mxu3 %v1667_v37  ;;  %v1675_v40 = vld [vmem:[%s2222_s1 + $0x218] sm:$0xff] }
 0x36d   :  { %v739_v51 = vmul.f32 %v2050_v43, %v2050_v43  ;;  %v729_v55 = vadd.f32 %v728_v50, %v2050_v43  ;;  %v1674_v50 = vld [vmem:[%s2222_s1 + $0x210] sm:$0xff] }
 0x36e   :  { %1079 = vmatpush.bf16.msra.mxu0 %v1675_v40  ;;  %1684 = vmatpush.bf16.msra.mxu1 %v1675_v40 }
 0x36f   :  { %v742_v57 = vadd.f32 %v741_v54, %v739_v51  ;;  %v1657_v54 = vld [vmem:[%s2222_s1 + $0x188] sm:$0xff] }
 0x370   :  { %v687_v48 = vpop.f32.mrf.mxu3  ;;  %1043 = vmatpush.bf16.msrb.mxu2 %v1657_v54 }
 0x371   :  { %v707_v52 = vadd.f32 %v706_v46, %v687_v48  ;;  %v1666_v46 = vld [vmem:[%s2222_s1 + $0x1d0] sm:$0xff] }
 0x372   :  { %1061 = vmatpush.bf16.msrb.mxu3 %v1666_v46  ;;  %1080 = vmatpush.bf16.msra.mxu0 %v1674_v50 }
 0x373   :  { %v2061_v56 = vadd.f32 %v725_v53, %v707_v52  ;;  %v1665_v52 = vld [vmem:[%s2222_s1 + $0x1c8] sm:$0xff]  ;;  %1685 = vmatpush.bf16.msra.mxu1 %v1674_v50 }
 0x375   :  { %v730_v58 = vadd.f32 %v729_v55, %v2061_v56  ;;  %v740_v59 = vmul.f32 %v2061_v56, %v2061_v56  ;;  %v1673_v55 = vld [vmem:[%s2222_s1 + $0x208] sm:$0xff] }
 0x376   :  { %1062 = vmatpush.bf16.msrb.mxu3 %v1665_v52  ;;  %1081 = vmatpush.bf16.msra.mxu0 %v1673_v55 }
 0x377   :  { %v731_v12 = vrot.slane %v730_v58, 4  ;;  %v743_v61 = vadd.f32 %v742_v57, %v740_v59  ;;  %v1664_v57 = vld [vmem:[%s2222_s1 + $0x1c0] sm:$0xff]  ;;  %1686 = vmatpush.bf16.msra.mxu1 %v1673_v55 }
 0x378   :  { %v1656_v59 = vld [vmem:[%s2222_s1 + $0x180] sm:$0xff] }
 0x379   :  { %v732_v63 = vadd.f32 %v731_v12, %v730_v58  ;;  %v744_v0 = vrot.slane %v743_v61, 4  ;;  %v1672_v12 = vld [vmem:[%s2222_s1 + $0x200] sm:$0xff]  ;;  %1044 = vmatpush.bf16.msrb.mxu2 %v1656_v59 }
 0x37a   :  { %1063 = vmatpush.bf16.msrb.mxu3 %v1664_v57  ;;  %1082 = vmatpush.bf16.msra.mxu0 %v1672_v12 }
 0x37b   :  { %v733_v2 = vrot.slane %v732_v63, 2  ;;  %v745_v3 = vadd.f32 %v744_v0, %v743_v61  ;;  %1687 = vmatpush.bf16.msra.mxu1 %v1672_v12 }
 0x37d   :  { %v734_v4 = vadd.f32 %v733_v2, %v732_v63  ;;  %v746_v5 = vrot.slane %v745_v3, 2 }
 0x37f   :  { %v735_v24 = vrot.slane %v734_v4, 1  ;;  %v747_v20 = vadd.f32 %v746_v5, %v745_v3 }
 0x381   :  { %v748_v6 = vrot.slane %v747_v20, 1  ;;  %v736_v21 = vadd.f32 %v735_v24, %v734_v4  ;;  %v1695_v4 = vld [vmem:[%s2224_s2 + $0x1] ss:$0 sm:$0xff] }
 0x383   :  { %v749_v22 = vadd.f32 %v748_v6, %v747_v20 }
 0x385   :  { %v750_v7 = vsel %vm385_vm11, %v736_v21, %v749_v22  ;;  %v1696_v22 = vld [vmem:[%s2225_s3 + $0x1] ss:$0 sm:$0xff] }
 0x386   :  { %751 = vrot.lane.b32.xlu2 %v750_v7, %s1706_s18 }
 0x3e0   :  { %v752_v8 = vpop.permute.xlu2 %751 }
 0x3e1   :  { %v753_v9 = vadd.f32 %v752_v8, %v750_v7 }
 0x3e3   :  { %754 = vrot.lane.b32.xlu2 %v753_v9, %s1707_s19 }
 0x43d   :  { %v755_v10 = vpop.permute.xlu2 %754 }
 0x43e   :  { %v756_v14 = vadd.f32 %v755_v10, %v753_v9 }
 0x440   :  { %757 = vrot.lane.b32.xlu0 %v756_v14, %s1708_s20 }
 0x4b2   :  { %v758_v15 = vpop.permute.xlu0 %757 }
 0x4b3   :  { %v759_v17 = vadd.f32 %v758_v15, %v756_v14 }
 0x4b5   :  { %760 = vrot.lane.b32.xlu1 %v759_v17, %s1709_s21 }
 0x527   :  { %v761_v33 = vpop.permute.xlu1 %760 }
 0x528   :  { %v762_v36 = vadd.f32 %v761_v33, %v759_v17 }
 0x52a   :  { %v763_v38 = vmul.f32 0.001953125, %v762_v36 }
 0x52c   :  { %v764_v44 = vmul.f32 %v763_v38, %v763_v38  ;;  %v787_v24 = vperm.slane %v763_v38, 0 }
 0x52e   :  { %v766_v48 = vrot.slane %v764_v44, 7  ;;  %v788_v21 = vsub.f32 %v2048_v42, %v787_v24  ;;  %v789_v7 = vsub.f32 %v2046_v41, %v787_v24  ;;  %v790_v8 = vsub.f32 %v2050_v43, %v787_v24 }
 0x52f   :  { %v791_v9 = vsub.f32 %v2061_v56, %v787_v24 }
 0x530   :  { %v768_v51 = vsub.f32 %v763_v38, %v766_v48 }
 0x532   :  { %v769_v53 = vmax.f32 %v768_v51, 0.0 }
 0x534   :  { %v770_v58 = vadd.f32 1e-05, %v769_v53 }
 0x536   :  { %1701 = vrsqrt.f32 %v770_v58  ;;  %vm777_vm2 = vweird.f32 %v770_v58 }
 0x53c   :  { %v1702_v61 = vpop.eup %1701 }
 0x53d   :  { %v772_v63 = vmul.f32 %v1702_v61, %v770_v58  ;;  %vm778_vm15 = vweird.f32 %v1702_v61 }
 0x53e   :  { %vm779_vm3 = vmor %vm777_vm2, %vm778_vm15 }
 0x53f   :  { %v773_v0 = vmul.f32 %v1702_v61, %v772_v63 }
 0x541   :  { %v774_v2 = vmul.f32 0.5, %v773_v0 }
 0x543   :  { %v775_v3 = vsub.f32 1.5, %v774_v2 }
 0x545   :  { %v776_v5 = vmul.f32 %v1702_v61, %v775_v3 }
 0x547   :  { %v780_v20 = vsel %vm779_vm3, %v1702_v61, %v776_v5 }
 0x548   :  { %v786_v6 = vmul.f32 %v1695_v4, %v780_v20 }
 0x54a   :  { %v792_v10 = vperm.slane %v786_v6, 1 }
 0x54c   :  { %v795_v14 = vmul.f32 %v792_v10, %v790_v8  ;;  %v796_v15 = vmul.f32 %v792_v10, %v791_v9  ;;  %v793_v17 = vmul.f32 %v792_v10, %v788_v21  ;;  %v794_v18 = vmul.f32 %v792_v10, %v789_v7 }
 0x54e   :  { %v804_v19 = vadd.f32 %v1696_v22, %v795_v14  ;;  %v805_v23 = vadd.f32 %v1696_v22, %v796_v15  ;;  %v802_v25 = vadd.f32 %v1696_v22, %v793_v17  ;;  %v803_v26 = vadd.f32 %v1696_v22, %v794_v18 }
 0x550   :  { %v808_v42 = vmax.f32 %v804_v19, 0.0  ;;  %v809_v27 = vmax.f32 %v805_v23, 0.0  ;;  %v806_v28 = vmax.f32 %v802_v25, 0.0  ;;  %v807_v30 = vmax.f32 %v803_v26, 0.0 }
 0x552   :  { %v812_v31 = vadd.f32 %v808_v42, %v1999_v1  ;;  %v810_v41 = vadd.f32 %v806_v28, %v2002_v11  ;;  %v811_v43 = vadd.f32 %v807_v30, %v2005_v13  ;;  %v813_v56 = vadd.f32 %v809_v27, %v2008_v29 }
 0x554   :  { %v826_v32 = vrot.slane %v810_v41, 1  ;;  %v827_v33 = vrot.slane %v811_v43, 1  ;;  %v839_v34 = vpack.c.bf16 %v811_v43, %v810_v41  ;;  %v814_v35 = vrot.slane %v810_v41, 7 }
 0x555   :  { %v815_v36 = vrot.slane %v811_v43, 7  ;;  %v817_v37 = vrot.slane %v813_v56, 7  ;;  %v828_v38 = vrot.slane %v812_v31, 1  ;;  %v829_v39 = vrot.slane %v813_v56, 1 }
 0x556   :  { %1064 = vmatmul.bf16.vlgmr.msrb.gmra.mxu3 %v839_v34  ;;  %v832_v40 = vsel %vm99_vm1, %v826_v32, %v827_v33  ;;  %v816_v50 = vrot.slane %v812_v31, 7  ;;  %v842_v51 = vpack.c.bf16 %v813_v56, %v812_v31 }
 0x557   :  { %v820_v1 = vsel %vm86_vm0, %v814_v35, %v815_v36  ;;  %v821_v11 = vsel %vm86_vm0, %v817_v37, %v814_v35  ;;  %v831_v13 = vsel %vm99_vm1, %v827_v33, %v828_v38  ;;  %v830_v29 = vsel %vm99_vm1, %v828_v38, %v829_v39 }
 0x558   :  { %v1595_v44 = vpack.c.bf16 %v820_v1, %v821_v11  ;;  %v1601_v46 = vpack.c.bf16 %v831_v13, %v832_v40  ;;  %v833_v48 = vsel %vm99_vm1, %v829_v39, %v826_v32  ;;  %v818_v52 = vsel %vm86_vm0, %v816_v50, %v817_v37 }
 0x559   :  { %v1604_v49 = vpack.c.bf16 %v833_v48, %v830_v29  ;;  %v819_v53 = vsel %vm86_vm0, %v815_v36, %v816_v50 }
 0x55a   :  { %1596 = vmatmul.msk.bf16.vlgmr.msrb.gmra.mxu2 %vm1850_vm5, %v1595_v44  ;;  %1602 = vmatmul.msk.bf16.vlgmr.msra.gmra.mxu0 %vm1855_vm6, %v1601_v46  ;;  %v1598_v54 = vpack.c.bf16 %v818_v52, %v819_v53  ;;  %v1697_v53 = vld [vmem:[%s2224_s2 + $0x2] ss:$0 sm:$0xff] }
 0x55b   :  { %1605 = vmatmul.msk.bf16.vlgmr.msra.gmra.mxu1 %vm1883_vm10, %v1604_v49 }
 0x566   :  { %1069 = vmatmul.bf16.gmra.mxu3 %v842_v51 }
 0x56a   :  { %1599 = vmatmul.msk.bf16.gmra.mxu2 %vm1878_vm9, %v1598_v54 }
 0x5d7   :  { %v1084_v57 = vpop.f32.mrf.mxu0 }
 0x5d8   :  { %v1089_v12 = vpop.f32.mrf.mxu1 }
 0x5d9   :  { %v1065_v45 = vpop.f32.mrf.mxu3 }
 0x5dd   :  { %v1046_v55 = vpop.f32.mrf.mxu2 }
 0x5de   :  { %v1066_v63 = vadd.f32 %v1065_v45, %v1046_v55 }
 0x5df   :  { %v1086_v2 = vpop.f32.mrf.mxu0 }
 0x5e0   :  { %v2183_v16 = vadd.f32 %v1084_v57, %v1066_v63  ;;  %v1091_v7 = vpop.f32.mrf.mxu1 }
 0x5e1   :  { %v1067_v47 = vpop.f32.mrf.mxu3 }
 0x5e2   :  { %v1103_v20 = vmul.f32 %v2183_v16, %v2183_v16 }
 0x5e5   :  { %v1048_v58 = vpop.f32.mrf.mxu2 }
 0x5e6   :  { %v1068_v59 = vadd.f32 %v1067_v47, %v1048_v58  ;;  %v1698_v58 = vld [vmem:[%s2225_s3 + $0x2] ss:$0 sm:$0xff] }
 0x5e8   :  { %v2181_v3 = vadd.f32 %v1086_v2, %v1068_v59 }
 0x5e9   :  { %v1070_v62 = vpop.f32.mrf.mxu3 }
 0x5ea   :  { %v1104_v60 = vmul.f32 %v2181_v3, %v2181_v3  ;;  %v1094_v6 = vadd.f32 %v2181_v3, %v2183_v16 }
 0x5ec   :  { %v1107_v8 = vadd.f32 %v1104_v60, %v1103_v20 }
 0x5ed   :  { %v1051_v61 = vpop.f32.mrf.mxu2 }
 0x5ee   :  { %v1071_v0 = vadd.f32 %v1070_v62, %v1051_v61 }
 0x5f0   :  { %v2185_v4 = vadd.f32 %v1089_v12, %v1071_v0 }
 0x5f1   :  { %v1072_v5 = vpop.f32.mrf.mxu3 }
 0x5f2   :  { %v1105_v21 = vmul.f32 %v2185_v4, %v2185_v4  ;;  %v1095_v9 = vadd.f32 %v1094_v6, %v2185_v4 }
 0x5f4   :  { %v1108_v14 = vadd.f32 %v1107_v8, %v1105_v21 }
 0x5f5   :  { %v1053_v24 = vpop.f32.mrf.mxu2 }
 0x5f6   :  { %v1073_v22 = vadd.f32 %v1072_v5, %v1053_v24 }
 0x5f8   :  { %v1092_v10 = vadd.f32 %v1091_v7, %v1073_v22 }
 0x5fa   :  { %v1096_v15 = vadd.f32 %v1095_v9, %v1092_v10  ;;  %v1106_v17 = vmul.f32 %v1092_v10, %v1092_v10 }
 0x5fc   :  { %v1097_v18 = vrot.slane %v1096_v15, 4  ;;  %v1109_v19 = vadd.f32 %v1108_v14, %v1106_v17 }
 0x5fe   :  { %v1098_v23 = vadd.f32 %v1097_v18, %v1096_v15  ;;  %v1110_v25 = vrot.slane %v1109_v19, 4 }
 0x600   :  { %v1099_v26 = vrot.slane %v1098_v23, 2  ;;  %v1111_v42 = vadd.f32 %v1110_v25, %v1109_v19 }
 0x602   :  { %v1100_v27 = vadd.f32 %v1099_v26, %v1098_v23  ;;  %v1112_v28 = vrot.slane %v1111_v42, 2 }
 0x604   :  { %v1101_v30 = vrot.slane %v1100_v27, 1  ;;  %v1113_v31 = vadd.f32 %v1112_v28, %v1111_v42 }
 0x606   :  { %v1114_v41 = vrot.slane %v1113_v31, 1  ;;  %v1102_v43 = vadd.f32 %v1101_v30, %v1100_v27 }
 0x608   :  { %v1115_v56 = vadd.f32 %v1114_v41, %v1113_v31 }
 0x60a   :  { %v1116_v32 = vsel %vm385_vm11, %v1102_v43, %v1115_v56 }
 0x60b   :  { %1117 = vrot.lane.b32.xlu2 %v1116_v32, %s1706_s18 }
 0x665   :  { %v1118_v33 = vpop.permute.xlu2 %1117 }
 0x666   :  { %v1119_v34 = vadd.f32 %v1118_v33, %v1116_v32 }
 0x668   :  { %1120 = vrot.lane.b32.xlu0 %v1119_v34, %s1707_s19 }
 0x6da   :  { %v1121_v35 = vpop.permute.xlu0 %1120 }
 0x6db   :  { %v1122_v36 = vadd.f32 %v1121_v35, %v1119_v34 }
 0x6dd   :  { %1123 = vrot.lane.b32.xlu1 %v1122_v36, %s1708_s20 }
 0x74f   :  { %v1124_v37 = vpop.permute.xlu1 %1123 }
 0x750   :  { %v1125_v38 = vadd.f32 %v1124_v37, %v1122_v36 }
 0x752   :  { %1126 = vrot.lane.b32.xlu2 %v1125_v38, %s1709_s21 }
 0x7ac   :  { %v1127_v39 = vpop.permute.xlu2 %1126 }
 0x7ad   :  { %v1128_v40 = vadd.f32 %v1127_v39, %v1125_v38 }
 0x7af   :  { %v1129_v1 = vmul.f32 0.001953125, %v1128_v40 }
 0x7b1   :  { %v1130_v11 = vmul.f32 %v1129_v1, %v1129_v1  ;;  %v1153_v45 = vperm.slane %v1129_v1, 0 }
 0x7b3   :  { %v1132_v13 = vrot.slane %v1130_v11, 7  ;;  %v1154_v57 = vsub.f32 %v2183_v16, %v1153_v45  ;;  %v1155_v62 = vsub.f32 %v2181_v3, %v1153_v45  ;;  %v1156_v59 = vsub.f32 %v2185_v4, %v1153_v45 }
 0x7b4   :  { %v1157_v12 = vsub.f32 %v1092_v10, %v1153_v45 }
 0x7b5   :  { %v1134_v29 = vsub.f32 %v1129_v1, %v1132_v13 }
 0x7b7   :  { %v1135_v44 = vmax.f32 %v1134_v29, 0.0 }
 0x7b9   :  { %v1136_v46 = vadd.f32 1e-05, %v1135_v44 }
 0x7bb   :  { %1703 = vrsqrt.f32 %v1136_v46  ;;  %vm1143_vm1 = vweird.f32 %v1136_v46 }
 0x7c1   :  { %v1704_v48 = vpop.eup %1703 }
 0x7c2   :  { %v1138_v49 = vmul.f32 %v1704_v48, %v1136_v46  ;;  %vm1144_vm0 = vweird.f32 %v1704_v48 }
 0x7c3   :  { %vm1145_vm4 = vmor %vm1143_vm1, %vm1144_vm0 }
 0x7c4   :  { %v1139_v50 = vmul.f32 %v1704_v48, %v1138_v49 }
 0x7c6   :  { %v1140_v51 = vmul.f32 0.5, %v1139_v50 }
 0x7c8   :  { %v1141_v52 = vsub.f32 1.5, %v1140_v51 }
 0x7ca   :  { %v1142_v54 = vmul.f32 %v1704_v48, %v1141_v52 }
 0x7cc   :  { %v1146_v55 = vsel %vm1145_vm4, %v1704_v48, %v1142_v54 }
 0x7cd   :  { %v1152_v47 = vmul.f32 %v1697_v53, %v1146_v55 }
 0x7cf   :  { %v1158_v61 = vperm.slane %v1152_v47, 1 }
 0x7d1   :  { %v1159_v63 = vmul.f32 %v1158_v61, %v1154_v57  ;;  %v1160_v0 = vmul.f32 %v1158_v61, %v1155_v62  ;;  %v1161_v2 = vmul.f32 %v1158_v61, %v1156_v59  ;;  %v1162_v60 = vmul.f32 %v1158_v61, %v1157_v12 }
 0x7d3   :  { %v1168_v5 = vadd.f32 %v1698_v58, %v1159_v63  ;;  %v1169_v24 = vadd.f32 %v1698_v58, %v1160_v0  ;;  %v1170_v20 = vadd.f32 %v1698_v58, %v1161_v2  ;;  %v1171_v6 = vadd.f32 %v1698_v58, %v1162_v60 }
 0x7d5   :  { %v1172_v21 = vmax.f32 %v1168_v5, 0.0  ;;  %v1173_v16 = vmax.f32 %v1169_v24, 0.0  ;;  %v1174_v22 = vmax.f32 %v1170_v20, 0.0  ;;  %v1175_v7 = vmax.f32 %v1171_v6, 0.0 }
 0x7d7   :  { %1176 = vst [vmem:[%s2226_s4] sm:$0xff] %v1172_v21 }
 0x7d8   :  { %1177 = vst [vmem:[%s2226_s4 + $0x8] sm:$0xff] %v1173_v16 }
 0x7d9   :  { %1178 = vst [vmem:[%s2226_s4 + $0x10] sm:$0xff] %v1174_v22 }
 0x7da   :  { %1179 = vst [vmem:[%s2226_s4 + $0x18] sm:$0xff] %v1175_v7 }

</bundles_post_ra>
